<compile_context>
chip_gen: v7x
topology: tpu7x:2x2x1
jax: 0.10.0
libtpu: 0.0.40
codegen_flags: <defaults>
</compile_context>

<pallas_src>
import functools

import jax
import jax.numpy as jnp
from jax.experimental import pallas as pl
from jax.experimental.pallas import tpu as pltpu


def _normalize_kernel(x_ref, o_ref, *, power):
    # x_ref / o_ref: (tm, D) tile in VMEM; reduction over the lane axis.
    x = x_ref[...]
    xf = x.astype(jnp.float32)  # no-op for f32 inputs

    if power == 2:
        # VPU squares + one rsqrt per row (tm transcendentals, not tm*D).
        s = jnp.sum(xf * xf, axis=-1, keepdims=True)
        inv = jax.lax.rsqrt(s)
    elif isinstance(power, int) and power > 0:
        # bit-stable integer power on the VPU, exact reciprocal of the root
        s = jnp.sum(jax.lax.integer_pow(xf, power), axis=-1, keepdims=True)
        inv = pl.reciprocal(jnp.power(s, 1.0 / power))
    else:
        # general (float) p fallback — matches x.pow(p).sum(...).pow(1/p)
        s = jnp.sum(jnp.power(xf, power), axis=-1, keepdims=True)
        inv = pl.reciprocal(jnp.power(s, 1.0 / power))

    # multiply by the broadcast per-row inverse instead of dividing per element
    o_ref[...] = (xf * inv).astype(o_ref.dtype)


def _auto_row_tile(N: int, D: int, itemsize: int) -> int:
    """Pick a row tile: large enough to amortize per-step pipeline overhead,
    small enough that double-buffered in+out tiles fit every generation's
    scoped-VMEM default (16 MiB v5e / 32 MiB v6e / 32 MiB v7x)."""
    # sublane pack factor: 8 rows for 4-byte, 16 for 2-byte, 32 for 1-byte
    align = 8 if itemsize >= 4 else (16 if itemsize == 2 else 32)
    budget_bytes = 2 << 20  # ~2 MiB per input tile -> <=8 MiB with dbl-buffered in+out
    tm = budget_bytes // max(D * itemsize, 1)
    tm = max(align, min(2048, (tm // align) * align))
    # never make the block larger than the (aligned-up) row count
    n_aligned = ((N + align - 1) // align) * align
    return min(tm, n_aligned)


def normalize(x: jax.Array, power: int = 2, *, tm: int | None = None) -> jax.Array:
    """Lp-normalize each row of a (N, D) array, matching Normalize.forward."""
    N, D = x.shape
    if tm is None:
        tm = _auto_row_tile(N, D, jnp.dtype(x.dtype).itemsize)

    kernel = functools.partial(_normalize_kernel, power=power)
    grid = (pl.cdiv(N, tm),)  # tail block (if any) is clipped by Pallas

    return pl.pallas_call(
        kernel,
        out_shape=jax.ShapeDtypeStruct((N, D), x.dtype),
        grid_spec=pltpu.PrefetchScalarGridSpec(
            num_scalar_prefetch=0,
            grid=grid,
            in_specs=[pl.BlockSpec((tm, D), lambda i: (i, 0))],
            out_specs=pl.BlockSpec((tm, D), lambda i: (i, 0)),
        ),
        compiler_params=pltpu.CompilerParams(
            dimension_semantics=("parallel",)
        ),
    )(x)


def _reference(x, power):
    norm = jnp.power(
        jnp.sum(jnp.power(x.astype(jnp.float32), power), axis=1, keepdims=True),
        1.0 / power,
    )
    return (x.astype(jnp.float32) / norm).astype(x.dtype)


if __name__ == "__main__":
    key = jax.random.PRNGKey(0)

    # Small feature tensor consistent with how Normalize is used in knn.py:
    # a batch of feature vectors, normalized along dim=1.
    # N deliberately NOT a multiple of the row tile to exercise the tail path.
    N, D = 20, 128
    x = jax.random.normal(key, (N, D), dtype=jnp.float32)

    out = normalize(x, power=2)
    out = jax.block_until_ready(out)

    ref = _reference(x, 2)
    assert out.shape == x.shape and out.dtype == x.dtype
    assert jnp.allclose(out, ref, atol=1e-5, rtol=1e-5)

    # second check: feature dim that is not a multiple of 128 (full-dim block
    # keeps it legal; stores are still a full-array write)
    x2 = jax.random.normal(jax.random.PRNGKey(1), (16, 64), dtype=jnp.float32)
    out2 = jax.block_until_ready(normalize(x2, power=2))
    assert jnp.allclose(out2, _reference(x2, 2), atol=1e-5, rtol=1e-5)

    # NOTE: for tensors this tiny, fusing the row scale into the consumer
    # (e.g. the knn matmul) or plain jnp is cheaper than a standalone
    # pallas_call; the kernel is sized for realistic N.

    print("KERNEL_OK")
</pallas_src>

<mosaic_0001>
module attributes {stable_mosaic.version = 11 : i64} {
  func.func @_normalize_kernel(%arg0: i32, %arg1: memref<24x128xf32, #tpu.memory_space<vmem>>, %arg2: memref<24x128xf32, #tpu.memory_space<vmem>>) attributes {dimension_semantics = [#tpu.dimension_semantics<parallel>], iteration_bounds = array<i64: 1>, scalar_prefetch = 0 : i64, scratch_operands = 0 : i64, tpu.core_type = #tpu.core_type<tc>, window_params = [{transform_indices = @transform_0, window_bounds = array<i64: 24, 128>}, {transform_indices = @transform_1, window_bounds = array<i64: 24, 128>}]} {
    %c0 = arith.constant 0 : index
    %c0_0 = arith.constant 0 : index
    %0 = vector.load %arg1[%c0, %c0_0] : memref<24x128xf32, #tpu.memory_space<vmem>>, vector<24x128xf32>
    %1 = arith.mulf %0, %0 : vector<24x128xf32>
    %cst = arith.constant dense<0.000000e+00> : vector<24xf32>
    %2 = vector.multi_reduction <add>, %1, %cst [1] : vector<24x128xf32> to vector<24xf32>
    %3 = vector.shape_cast %2 : vector<24xf32> to vector<24x1xf32>
    %4 = math.rsqrt %3 : vector<24x1xf32>
    %5 = vector.broadcast %4 : vector<24x1xf32> to vector<24x128xf32>
    %6 = arith.mulf %0, %5 : vector<24x128xf32>
    %c0_1 = arith.constant 0 : index
    %c0_2 = arith.constant 0 : index
    %7 = vector.load %arg2[%c0_1, %c0_2] : memref<24x128xf32, #tpu.memory_space<vmem>>, vector<24x128xf32>
    tpu.vector_store %arg2[%c0_1, %c0_2], %6 {strides = array<i32>} : memref<24x128xf32, #tpu.memory_space<vmem>>, vector<24x128xf32>,
    return
  }
  func.func @transform_0(%arg0: i32) -> (i32, i32) {
    %c0_i32 = arith.constant 0 : i32
    %c0_i32_0 = arith.constant 0 : i32
    return %arg0, %c0_i32 : i32, i32
  }
  func.func @transform_1(%arg0: i32) -> (i32, i32) {
    %c0_i32 = arith.constant 0 : i32
    %c0_i32_0 = arith.constant 0 : i32
    return %arg0, %c0_i32 : i32, i32
  }
}

</mosaic_0001>

<bundles_post_ra>
// kernel: tpu_custom_call.1
= control target key start
LH: loop header
LB: loop body
LE: loop exit
PB: predicated region body
PF: predicated region fallthrough
CT: control target
= control target key end

     0   :  { %6 = vsyncpa [#allocation3], 0  ;;  %s163_s0 = inlined_call_operand.hbm [shape: f32[20,128], index: 0, kind: input, shape index: {}]   ;;  %s164_s1 = inlined_call_operand.hbm [shape: f32[20,128], index: 1, kind: output, shape index: {}]  }
   0x1   :  { %7 = vsyncpa [#allocation4], 0  ;;  %s119_s6 = smov [#allocation2]   ;;  %s71_s10 = scalar_lea.hbm %s163_s0, 384 }
   0x2   :  { %s13_s7 = sshll.u32 %s119_s6, 4  ;;  %p72_p0 = scmp.ne.s32.totalorder %s163_s0, %s71_s10  ;;  %s14_s7 = int_to_ptr.vmem [resolvable:$true] %s13_s7 }
   0x3   :  { %p75_p1 = scmp.lt.u32.totalorder %s71_s10, %s163_s0 }
   0x5   :  { %p77_p2 = pnand %p75_p1, %p72_p0 }
   0x7   :  { %80 = shalt.err (!%p77_p2)
}
   0x8   :  { %s81_s15 = scalar_lea.vmem %s14_s7, 384  ;;  %p86_p4 = scmp.lt.s32.totalorder %s14_s7, %s14_s7 }
   0x9   :  { %p82_p3 = scmp.ne.s32.totalorder %s14_s7, %s81_s15  ;;  %p87_p5 = scmp.lt.s32.totalorder %s81_s15, %s81_s15 }
   0xb   :  { %p88_p6 = por %p87_p5, %p86_p4 }
   0xd   :  { %p89_p7 = pnand %p88_p6, %p82_p3 }
   0xf   :  { %92 = shalt.err (!%p89_p7)
}
  0x10   :  { %s120_s16 = smov 128   ;;  %s121_s17 = smov 8  }
  0x11   :  { %19 = dma.hbm_to_vmem [thread:$0]  %s163_s0, 384, %s14_s7, [#allocation3], %s120_s16, %s120_s16, %s121_s17  }
  0x12   :  { %115 = dma.done.wait [#allocation3], 384  }
  0x13   :  { %116 = vsyncadd [#allocation3], 4294966912  ;;  %v23_v0 = vld [vmem:[#allocation2] sm:$0xff]  ;;  %v25_v1 = vld [vmem:[#allocation2 + $0x10] sm:$0xff]  ;;  %s122_s0 = smov [#allocation5]  }
  0x14   :  { %v24_v2 = vld [vmem:[#allocation2 + $0x8] sm:$0xff]  ;;  %v26_v3 = vmul.f32 %v23_v0, %v23_v0  ;;  %v28_v4 = vmul.f32 %v25_v1, %v25_v1  ;;  %s49_s20 = sshll.u32 %s122_s0, 4  ;;  %s50_s20 = int_to_ptr.vmem [resolvable:$true] %s49_s20 }
  0x15   :  { %v27_v5 = vmul.f32 %v24_v2, %v24_v2  ;;  %s93_s21 = scalar_lea.vmem %s50_s20, 384  ;;  %p98_p9 = scmp.lt.s32.totalorder %s50_s20, %s50_s20 }
  0x16   :  { %29 = vadd.xlane.f32.xlu0 %v26_v3  ;;  %33 = vadd.xlane.f32.xlu1 %v28_v4  ;;  %p94_p8 = scmp.ne.s32.totalorder %s50_s20, %s93_s21  ;;  %p99_p10 = scmp.lt.s32.totalorder %s93_s21, %s93_s21 }
  0x18   :  { %p100_p11 = por %p99_p10, %p98_p9 }
  0x1a   :  { %31 = vadd.xlane.f32.xlu0 %v27_v5  ;;  %p101_p12 = pnand %p100_p11, %p94_p8 }
  0xa3   :  { %v30_v6 = vpop.xlane.xlu0 %29  ;;  %v34_v7 = vpop.xlane.xlu1 %33 }
  0xa4   :  { %65 = vrsqrt.f32 %v30_v6 }
  0xa5   :  { %67 = vrsqrt.f32 %v34_v7 }
  0xa7   :  { %v32_v8 = vpop.xlane.xlu0 %31 }
  0xa8   :  { %69 = vrsqrt.f32 %v32_v8 }
  0xae   :  { %v66_v9 = vpop.eup %65 }
  0xaf   :  { %v68_v10 = vpop.eup %67  ;;  %v38_v11 = vmul.f32 %v66_v9, %v23_v0 }
  0xb0   :  { %v40_v12 = vmul.f32 %v68_v10, %v25_v1 }
  0xb1   :  { %41 = vst [vmem:[#allocation5] sm:$0xff] %v38_v11 }
  0xb2   :  { %v70_v13 = vpop.eup %69  ;;  %43 = vst [vmem:[#allocation5 + $0x10] sm:$0xff] %v40_v12 }
  0xb3   :  { %v39_v14 = vmul.f32 %v70_v13, %v24_v2 }
  0xb5   :  { %42 = vst [vmem:[#allocation5 + $0x8] sm:$0xff] %v39_v14 }
  0xb6   :  { %104 = shalt.err (!%p101_p12)
}
  0xb7   :  { %s105_s24 = scalar_lea.hbm %s164_s1, 384 }
  0xb8   :  { %p106_p13 = scmp.ne.s32.totalorder %s164_s1, %s105_s24  ;;  %p109_p0 = scmp.lt.u32.totalorder %s105_s24, %s164_s1 }
  0xba   :  { %p111_p1 = pnand %p109_p0, %p106_p13 }
  0xbc   :  { %114 = shalt.err (!%p111_p1)
}
  0xbd   :  { %55 = dma.vmem_to_hbm [thread:$0]  %s50_s20, 384, %s164_s1, [#allocation4], %s120_s16, %s120_s16, %s121_s17  }
  0xbe   :  { %117 = dma.done.wait [#allocation4], 384  }
  0xbf   :  { %118 = vsyncadd [#allocation4], 4294966912 }
  0xc0   :  { %59 = vsyncpa [#allocation3], 1 }
  0xc1   :  { %60 = vsyncpa [#allocation4], 1 }

</bundles_post_ra>
